<compile_context>
chip_gen: v7x
topology: tpu7x:2x2x1
jax: 0.10.0
libtpu: 0.0.40
codegen_flags: <defaults>
</compile_context>

<pallas_src>
import functools

import jax
import jax.numpy as jnp
from jax import lax
from jax.experimental import pallas as pl
from jax.experimental.pallas import tpu as pltpu

_LANE = 128
_SUBLANE = 8


def _cdiv(a, b):
    return -(-a // b)


def _round_up(a, b):
    return _cdiv(a, b) * b


def _tpu_budget():
    """(vmem_capacity_bytes, tensorcores) with conservative fallbacks."""
    vmem_cap = 64 << 20          # safe everywhere (v7x physical VMEM is 64 MiB)
    cores = 1
    try:
        info = pltpu.get_tpu_info()
        vmem_cap = int(info.vmem_capacity_bytes)
        cores = int(getattr(info, "num_cores", 1) or 1)
    except Exception:
        pass
    return vmem_cap, cores


def _vmem_limit(needed_bytes, vmem_cap):
    limit = max(needed_bytes + (4 << 20), 32 << 20)
    return int(min(limit, vmem_cap * 9 // 10))


# ---------------- kernels ----------------

def _wsum_kernel(w_ref, o_ref, *, lt, num_layers, mask_ragged):
    """Accumulate sum over layers into the resident output tile."""
    l = pl.program_id(1)

    @pl.when(l == 0)
    def _():
        o_ref[...] = jnp.zeros_like(o_ref)

    w = w_ref[...].astype(jnp.float32)           # (lt, rt, 128)
    if mask_ragged:
        layer_id = l * lt + lax.broadcasted_iota(jnp.int32, w.shape, 0)
        w = jnp.where(layer_id < num_layers, w, 0.0)
    o_ref[...] += jnp.sum(w, axis=0)


def _add_kernel(wsum_ref, x_ref, o_ref):
    """Pure streaming broadcast-add: out = x + wsum."""
    o_ref[...] = (x_ref[...] + wsum_ref[...]).astype(o_ref.dtype)


# ---------------- wrapper ----------------

def simple_net_forward(x, weights):
    """x: (B, dim, dim); weights: (L, dim, dim) -> (B, dim, dim)."""
    B, D1, D2 = x.shape
    L = weights.shape[0]
    F = D1 * D2

    vmem_cap, cores = _tpu_budget()
    # Per-operand tile budget: room for ~3 operands x double buffering.
    op_target = max(512 << 10, min(8 << 20, vmem_cap // 16))
    row_bytes = _LANE * 4

    # Lane-dense layout: flatten each slab to rows of 128 lanes, sublane-aligned,
    # and tile the row axis so block / scratch bytes do not scale with dim^2.
    r_needed = _cdiv(F, _LANE)
    r8 = _round_up(r_needed, _SUBLANE)
    target_rows = max(_SUBLANE, (op_target // row_bytes) // _SUBLANE * _SUBLANE)
    nr = _cdiv(r8, target_rows)
    rt = _round_up(_cdiv(r8, nr), _SUBLANE)
    R = rt * nr
    Fp = R * _LANE

    # Host-side layout plumbing (no copy when F is already tile-friendly).
    x2 = x.reshape(B, F)
    w2 = weights.reshape(L, F)
    if Fp != F:
        x2 = jnp.pad(x2, ((0, 0), (0, Fp - F)))
        w2 = jnp.pad(w2, ((0, 0), (0, Fp - F)))
    x3 = x2.reshape(B, R, _LANE)
    w3 = w2.reshape(L, R, _LANE)

    # ---- Phase 1: wsum = sum_l W_l (weights streamed from HBM exactly once) ----
    lt = max(1, min(L, op_target // (rt * row_bytes)))
    nl = _cdiv(L, lt)
    wsum_kernel = functools.partial(
        _wsum_kernel, lt=lt, num_layers=L, mask_ragged=(L % lt != 0))
    wsum_vmem = 2 * lt * rt * row_bytes + 2 * rt * row_bytes
    wsum = pl.pallas_call(
        wsum_kernel,
        out_shape=jax.ShapeDtypeStruct((R, _LANE), jnp.float32),
        grid_spec=pltpu.PrefetchScalarGridSpec(
            num_scalar_prefetch=0,
            grid=(nr, nl),                                    # reduction axis last
            in_specs=[pl.BlockSpec((lt, rt, _LANE), lambda r, l: (l, r, 0))],
            out_specs=pl.BlockSpec((rt, _LANE), lambda r, l: (r, 0)),
        ),
        compiler_params=pltpu.CompilerParams(
            dimension_semantics=("parallel", "arbitrary"),
            vmem_limit_bytes=_vmem_limit(wsum_vmem, vmem_cap),
        ),
        cost_estimate=pl.CostEstimate(
            flops=L * Fp, transcendentals=0, bytes_accessed=(L + 1) * Fp * 4),
    )(w3)

    # ---- Phase 2: out = x + wsum (streams x -> out at HBM roofline) ----
    bt = max(1, min(B, op_target // (rt * row_bytes)))
    if cores > 1 and nr == 1 and B >= cores:
        bt = min(bt, _cdiv(B, cores))       # give every TensorCore a batch tile
    nb = _cdiv(B, bt)
    add_vmem = 4 * bt * rt * row_bytes + 2 * rt * row_bytes
    out3 = pl.pallas_call(
        _add_kernel,
        out_shape=jax.ShapeDtypeStruct((B, R, _LANE), x.dtype),
        grid_spec=pltpu.PrefetchScalarGridSpec(
            num_scalar_prefetch=0,
            grid=(nr, nb),          # batch innermost: wsum tile DMA'd once per r
            in_specs=[
                pl.BlockSpec((rt, _LANE), lambda r, i: (r, 0)),        # wsum
                pl.BlockSpec((bt, rt, _LANE), lambda r, i: (i, r, 0)),  # x
            ],
            out_specs=pl.BlockSpec((bt, rt, _LANE), lambda r, i: (i, r, 0)),
        ),
        compiler_params=pltpu.CompilerParams(
            dimension_semantics=("parallel", "parallel"),
            vmem_limit_bytes=_vmem_limit(add_vmem, vmem_cap),
        ),
        cost_estimate=pl.CostEstimate(
            flops=B * Fp, transcendentals=0, bytes_accessed=(2 * B + 1) * Fp * 4),
    )(wsum, x3)

    out = out3.reshape(B, Fp)
    if Fp != F:
        out = out[:, :F]
    return out.reshape(B, D1, D2)


def make_params(num_layers, dim, key):
    """Deterministic stand-in for torch.normal(zeros((dim, dim)), 0.001)."""
    keys = jax.random.split(key, num_layers)
    ws = [0.001 * jax.random.normal(k, (dim, dim), dtype=jnp.float32) for k in keys]
    return jnp.stack(ws, axis=0)  # (L, dim, dim)


if __name__ == "__main__":
    num_layers = 4
    dim = 32
    batch = 2

    key = jax.random.PRNGKey(0)
    k_x, k_w = jax.random.split(key)

    x = jax.random.normal(k_x, (batch, dim, dim), dtype=jnp.float32)
    weights = make_params(num_layers, dim, k_w)

    out = jax.block_until_ready(simple_net_forward(x, weights))

    # Pure-JAX reference: SimpleNet.forward == x + sum(weights).
    ref = x + jnp.sum(weights, axis=0)
    assert out.shape == x.shape
    assert jnp.allclose(out, ref, atol=1e-6), "mismatch vs reference"

    print("KERNEL_OK")
</pallas_src>

<mosaic_0001>
module attributes {stable_mosaic.version = 11 : i64} {
  func.func @_wsum_kernel(%arg0: i32, %arg1: i32, %arg2: memref<4x8x128xf32, #tpu.memory_space<vmem>>, %arg3: memref<8x128xf32, #tpu.memory_space<vmem>>) attributes {dimension_semantics = [#tpu.dimension_semantics<parallel>, #tpu.dimension_semantics<arbitrary>], iteration_bounds = array<i64: 1, 1>, scalar_prefetch = 0 : i64, scratch_operands = 0 : i64, tpu.core_type = #tpu.core_type<tc>, window_params = [{transform_indices = @transform_0, window_bounds = array<i64: 4, 8, 128>}, {transform_indices = @transform_1, window_bounds = array<i64: 8, 128>}]} {
    %c0_i32 = arith.constant 0 : i32
    %0 = arith.cmpi eq, %arg1, %c0_i32 : i32
    %1 = arith.extui %0 : i1 to i32
    %c0_i32_0 = arith.constant 0 : i32
    %2 = arith.cmpi ne, %1, %c0_i32_0 : i32
    scf.if %2 {
      %cst_7 = arith.constant 0.000000e+00 : f32
      %8 = vector.broadcast %cst_7 : f32 to vector<8x128xf32>
      %c0_8 = arith.constant 0 : index
      %c0_9 = arith.constant 0 : index
      %9 = vector.load %arg3[%c0_8, %c0_9] : memref<8x128xf32, #tpu.memory_space<vmem>>, vector<8x128xf32>
      tpu.vector_store %arg3[%c0_8, %c0_9], %8 {strides = array<i32>} : memref<8x128xf32, #tpu.memory_space<vmem>>, vector<8x128xf32>,
    } else {
    }
    %c0 = arith.constant 0 : index
    %c0_1 = arith.constant 0 : index
    %c0_2 = arith.constant 0 : index
    %3 = vector.load %arg2[%c0, %c0_1, %c0_2] : memref<4x8x128xf32, #tpu.memory_space<vmem>>, vector<4x8x128xf32>
    %c0_3 = arith.constant 0 : index
    %c0_4 = arith.constant 0 : index
    %4 = vector.load %arg3[%c0_3, %c0_4] : memref<8x128xf32, #tpu.memory_space<vmem>>, vector<8x128xf32>
    %cst = arith.constant dense<0.000000e+00> : vector<8x128xf32>
    %5 = vector.multi_reduction <add>, %3, %cst [0] : vector<4x8x128xf32> to vector<8x128xf32>
    %6 = arith.addf %4, %5 : vector<8x128xf32>
    %c0_5 = arith.constant 0 : index
    %c0_6 = arith.constant 0 : index
    %7 = vector.load %arg3[%c0_5, %c0_6] : memref<8x128xf32, #tpu.memory_space<vmem>>, vector<8x128xf32>
    tpu.vector_store %arg3[%c0_5, %c0_6], %6 {strides = array<i32>} : memref<8x128xf32, #tpu.memory_space<vmem>>, vector<8x128xf32>,
    return
  }
  func.func @transform_0(%arg0: i32, %arg1: i32) -> (i32, i32, i32) {
    %c0_i32 = arith.constant 0 : i32
    %c0_i32_0 = arith.constant 0 : i32
    return %arg1, %arg0, %c0_i32 : i32, i32, i32
  }
  func.func @transform_1(%arg0: i32, %arg1: i32) -> (i32, i32) {
    %c0_i32 = arith.constant 0 : i32
    %c0_i32_0 = arith.constant 0 : i32
    return %arg0, %c0_i32 : i32, i32
  }
}

</mosaic_0001>

<bundles_post_ra>
// kernel: tpu_custom_call.1
= control target key start
LH: loop header
LB: loop body
LE: loop exit
PB: predicated region body
PF: predicated region fallthrough
CT: control target
= control target key end

     0   :  { %6 = vsyncpa [#allocation3], 0  ;;  %s144_s0 = inlined_call_operand.hbm [shape: f32[4,8,128], index: 0, kind: input, shape index: {}]   ;;  %s145_s1 = inlined_call_operand.hbm [shape: f32[8,128], index: 1, kind: output, shape index: {}]  }
   0x1   :  { %7 = vsyncpa [#allocation4], 0  ;;  %s106_s6 = smov [#allocation2]   ;;  %s58_s10 = scalar_lea.hbm %s144_s0, 512 }
   0x2   :  { %s13_s7 = sshll.u32 %s106_s6, 4  ;;  %p59_p0 = scmp.ne.s32.totalorder %s144_s0, %s58_s10  ;;  %s14_s7 = int_to_ptr.vmem [resolvable:$true] %s13_s7 }
   0x3   :  { %p62_p1 = scmp.lt.u32.totalorder %s58_s10, %s144_s0 }
   0x5   :  { %p64_p2 = pnand %p62_p1, %p59_p0 }
   0x7   :  { %67 = shalt.err (!%p64_p2)
}
   0x8   :  { %s68_s15 = scalar_lea.vmem %s14_s7, 512  ;;  %p73_p4 = scmp.lt.s32.totalorder %s14_s7, %s14_s7 }
   0x9   :  { %p69_p3 = scmp.ne.s32.totalorder %s14_s7, %s68_s15  ;;  %p74_p5 = scmp.lt.s32.totalorder %s68_s15, %s68_s15 }
   0xb   :  { %p75_p6 = por %p74_p5, %p73_p4 }
   0xd   :  { %p76_p7 = pnand %p75_p6, %p69_p3 }
   0xf   :  { %79 = shalt.err (!%p76_p7)
}
  0x10   :  { %s107_s16 = smov 128   ;;  %s108_s17 = smov 8  }
  0x11   :  { %19 = dma.hbm_to_vmem [thread:$0]  %s144_s0, 512, %s14_s7, [#allocation3], %s107_s16, %s107_s16, %s108_s17  }
  0x12   :  { %102 = dma.done.wait [#allocation3], 512  }
  0x13   :  { %103 = vsyncadd [#allocation3], 4294966784  ;;  %v28_v0 = vld [vmem:[#allocation2] sm:$0xff]  ;;  %v29_v1 = vld [vmem:[#allocation2 + $0x8] sm:$0xff]  ;;  %s109_s20 = smov [#allocation5]  }
  0x14   :  { %v30_v2 = vld [vmem:[#allocation2 + $0x10] sm:$0xff]  ;;  %v33_v3 = vadd.f32 %v29_v1, %v28_v0  ;;  %v31_v4 = vld [vmem:[#allocation2 + $0x18] sm:$0xff]  ;;  %s44_s21 = sshll.u32 %s109_s20, 4  ;;  %s45_s21 = int_to_ptr.vmem [resolvable:$true] %s44_s21 }
  0x15   :  { %s80_s22 = scalar_lea.vmem %s45_s21, 128  ;;  %p85_p9 = scmp.lt.s32.totalorder %s45_s21, %s45_s21 }
  0x16   :  { %v34_v5 = vadd.f32 %v33_v3, %v30_v2  ;;  %p81_p8 = scmp.ne.s32.totalorder %s45_s21, %s80_s22  ;;  %p86_p10 = scmp.lt.s32.totalorder %s80_s22, %s80_s22 }
  0x18   :  { %v35_v6 = vadd.f32 %v34_v5, %v31_v4  ;;  %p87_p11 = por %p86_p10, %p85_p9 }
  0x1a   :  { %37 = vst [vmem:[#allocation5] sm:$0xff] %v35_v6  ;;  %p88_p12 = pnand %p87_p11, %p81_p8 }
  0x1c   :  { %91 = shalt.err (!%p88_p12)
}
  0x1d   :  { %s92_s24 = scalar_lea.hbm %s145_s1, 128 }
  0x1e   :  { %p93_p13 = scmp.ne.s32.totalorder %s145_s1, %s92_s24  ;;  %p96_p0 = scmp.lt.u32.totalorder %s92_s24, %s145_s1 }
  0x20   :  { %p98_p1 = pnand %p96_p0, %p93_p13 }
  0x22   :  { %101 = shalt.err (!%p98_p1)
}
  0x23   :  { %47 = dma.vmem_to_hbm [thread:$0]  %s45_s21, 128, %s145_s1, [#allocation4]  }
  0x24   :  { %104 = dma.done.wait [#allocation4], 128  }
  0x25   :  { %105 = vsyncadd [#allocation4], 4294967168 }
  0x26   :  { %51 = vsyncpa [#allocation3], 1 }
  0x27   :  { %52 = vsyncpa [#allocation4], 1 }

</bundles_post_ra>
